<compile_context>
chip_gen: v7x
topology: tpu7x:2x2x1
jax: 0.10.0
libtpu: 0.0.40
codegen_flags: <defaults>
</compile_context>

<pallas_src>
import functools
import math

import jax
import jax.numpy as jnp
from jax import lax
from jax.experimental import pallas as pl
from jax.experimental.pallas import tpu as pltpu


def _lif_kernel(x_ref, o_ref, *, tau, thresh, T, unroll):
    # x_ref / o_ref: (T, ftile, 128). The membrane is carried as a register
    # value across the fused time loop (recurrence stays sequential per tile).
    def body(t, mem):
        mem = mem * tau + x_ref[t].astype(jnp.float32)
        fired = mem >= thresh                       # ZIF fwd: (mem - thresh >= 0)
        o_ref[t] = jnp.where(fired, 1.0, 0.0).astype(o_ref.dtype)
        return jnp.where(fired, 0.0, mem)           # hard reset

    mem0 = jnp.zeros(x_ref.shape[1:], jnp.float32)
    lax.fori_loop(0, T, body, mem0, unroll=unroll)


def lif_spike_forward(x, T, thresh=1.0, tau=1.0):
    """LIFSpike.forward (mode='bptt', hard reset) for x of shape (T*B, ...)."""
    TB = x.shape[0]
    assert TB % T == 0, "leading dim must be T*B"
    B = TB // T
    M = B * math.prod(x.shape[1:])        # flattened feature count per timestep

    # Choose the feature tile (sublane rows) so that the double-buffered
    # input + output blocks of shape (T, ftile, 128) f32 stay within ~8 MiB:
    #   total VMEM ~= 2 (dbl-buf) * 2 (in+out) * T * ftile * 128 * 4 B
    # This fits v5e's 16 MiB default scoped VMEM and v7x's 32 MiB with margin.
    itemsize = 4
    budget_bytes = 8 << 20
    max_ftile = budget_bytes // (4 * T * 128 * itemsize)
    max_ftile = max(8, min(2048, (max_ftile // 8) * 8))

    R = pl.cdiv(M, 128)                          # lane-major rows
    ftile = min(max_ftile, ((R + 7) // 8) * 8)   # multiple of 8 sublane rows
    Rp = pl.cdiv(R, ftile) * ftile               # pad rows to a multiple of ftile
    Mp = Rp * 128
    num_ftiles = Rp // ftile

    xf = x.reshape(T, M)
    if Mp != M:
        xf = jnp.pad(xf, ((0, 0), (0, Mp - M)))  # zero-pad: padded lanes never spike
    xr = xf.reshape(T, Rp, 128)

    kernel = functools.partial(
        _lif_kernel, tau=float(tau), thresh=float(thresh), T=T, unroll=(T <= 16))

    out = pl.pallas_call(
        kernel,
        out_shape=jax.ShapeDtypeStruct((T, Rp, 128), x.dtype),
        grid_spec=pltpu.PrefetchScalarGridSpec(
            num_scalar_prefetch=0,
            grid=(num_ftiles,),
            in_specs=[pl.BlockSpec((T, ftile, 128), lambda j: (0, j, 0))],
            out_specs=pl.BlockSpec((T, ftile, 128), lambda j: (0, j, 0)),
        ),
        compiler_params=pltpu.CompilerParams(
            dimension_semantics=("parallel",)),
    )(xr)

    # TODO(synk): emitting spikes as bf16/int8 would cut writeback bytes ~2-4x
    # on this memory-bound kernel, but would change the caller-side dtype contract.
    out = out.reshape(T, Mp)
    if Mp != M:
        out = out[:, :M]
    return out.reshape(x.shape)


def lif_reference(x, T, thresh=1.0, tau=1.0):
    """Pure-JAX reference mirroring the PyTorch forward (mode='bptt')."""
    B = x.shape[0] // T
    xs = x.reshape((T, B) + x.shape[1:])
    mem = jnp.zeros_like(xs[0])
    outs = []
    for t in range(T):
        mem = mem * tau + xs[t]
        spike = (mem - thresh >= 0.0).astype(x.dtype)
        mem = (1.0 - spike) * mem
        outs.append(spike)
    return jnp.stack(outs, axis=0).reshape(x.shape)


if __name__ == "__main__":
    T, B, C, H, W = 8, 2, 4, 16, 16
    thresh, tau = 1.0, 1.0

    key = jax.random.PRNGKey(0)
    # values in [0, 2) so the membrane actually crosses threshold sometimes
    x = jax.random.uniform(key, (T * B, C, H, W), dtype=jnp.float32,
                           minval=0.0, maxval=2.0)

    out = lif_spike_forward(x, T, thresh=thresh, tau=tau)
    out = jax.block_until_ready(out)

    ref = lif_reference(x, T, thresh=thresh, tau=tau)
    assert out.shape == x.shape
    assert out.dtype == x.dtype
    assert jnp.allclose(out, ref), "mismatch vs reference LIF forward"

    print("KERNEL_OK")
</pallas_src>

<mosaic_0001>
module attributes {stable_mosaic.version = 11 : i64} {
  func.func @_lif_kernel(%arg0: i32, %arg1: memref<8x16x128xf32, #tpu.memory_space<vmem>>, %arg2: memref<8x16x128xf32, #tpu.memory_space<vmem>>) attributes {dimension_semantics = [#tpu.dimension_semantics<parallel>], iteration_bounds = array<i64: 1>, scalar_prefetch = 0 : i64, scratch_operands = 0 : i64, tpu.core_type = #tpu.core_type<tc>, window_params = [{transform_indices = @transform_0, window_bounds = array<i64: 8, 16, 128>}, {transform_indices = @transform_1, window_bounds = array<i64: 8, 16, 128>}]} {
    %cst = arith.constant 0.000000e+00 : f32
    %0 = vector.broadcast %cst : f32 to vector<16x128xf32>
    %c0_i32 = arith.constant 0 : i32
    %cst_0 = arith.constant 1.000000e+00 : f32
    %1 = vector.broadcast %cst_0 : f32 to vector<16x128xf32>
    %2 = arith.mulf %0, %1 : vector<16x128xf32>
    %3 = arith.index_cast %c0_i32 : i32 to index
    %c0 = arith.constant 0 : index
    %c0_1 = arith.constant 0 : index
    %4 = vector.load %arg1[%3, %c0, %c0_1] : memref<8x16x128xf32, #tpu.memory_space<vmem>>, vector<1x16x128xf32>
    %5 = vector.shape_cast %4 : vector<1x16x128xf32> to vector<16x128xf32>
    %6 = arith.addf %2, %5 : vector<16x128xf32>
    %cst_2 = arith.constant 1.000000e+00 : f32
    %7 = vector.broadcast %cst_2 : f32 to vector<16x128xf32>
    %8 = arith.cmpf oge, %6, %7 : vector<16x128xf32>
    %cst_3 = arith.constant 1.000000e+00 : f32
    %cst_4 = arith.constant 0.000000e+00 : f32
    %9 = vector.broadcast %cst_3 : f32 to vector<16x128xf32>
    %10 = vector.broadcast %cst_4 : f32 to vector<16x128xf32>
    %11 = arith.select %8, %9, %10 : vector<16x128xi1>, vector<16x128xf32>
    %12 = arith.index_cast %c0_i32 : i32 to index
    %c0_5 = arith.constant 0 : index
    %c0_6 = arith.constant 0 : index
    %13 = vector.load %arg2[%12, %c0_5, %c0_6] : memref<8x16x128xf32, #tpu.memory_space<vmem>>, vector<1x16x128xf32>
    %14 = vector.shape_cast %13 : vector<1x16x128xf32> to vector<16x128xf32>
    %15 = vector.shape_cast %11 : vector<16x128xf32> to vector<1x16x128xf32>
    tpu.vector_store %arg2[%12, %c0_5, %c0_6], %15 {strides = array<i32>} : memref<8x16x128xf32, #tpu.memory_space<vmem>>, vector<1x16x128xf32>,
    %cst_7 = arith.constant 0.000000e+00 : f32
    %16 = vector.broadcast %cst_7 : f32 to vector<16x128xf32>
    %17 = arith.select %8, %16, %6 : vector<16x128xi1>, vector<16x128xf32>
    %c1_i32 = arith.constant 1 : i32
    %cst_8 = arith.constant 1.000000e+00 : f32
    %18 = vector.broadcast %cst_8 : f32 to vector<16x128xf32>
    %19 = arith.mulf %17, %18 : vector<16x128xf32>
    %20 = arith.index_cast %c1_i32 : i32 to index
    %c0_9 = arith.constant 0 : index
    %c0_10 = arith.constant 0 : index
    %21 = vector.load %arg1[%20, %c0_9, %c0_10] : memref<8x16x128xf32, #tpu.memory_space<vmem>>, vector<1x16x128xf32>
    %22 = vector.shape_cast %21 : vector<1x16x128xf32> to vector<16x128xf32>
    %23 = arith.addf %19, %22 : vector<16x128xf32>
    %cst_11 = arith.constant 1.000000e+00 : f32
    %24 = vector.broadcast %cst_11 : f32 to vector<16x128xf32>
    %25 = arith.cmpf oge, %23, %24 : vector<16x128xf32>
    %cst_12 = arith.constant 1.000000e+00 : f32
    %cst_13 = arith.constant 0.000000e+00 : f32
    %26 = vector.broadcast %cst_12 : f32 to vector<16x128xf32>
    %27 = vector.broadcast %cst_13 : f32 to vector<16x128xf32>
    %28 = arith.select %25, %26, %27 : vector<16x128xi1>, vector<16x128xf32>
    %29 = arith.index_cast %c1_i32 : i32 to index
    %c0_14 = arith.constant 0 : index
    %c0_15 = arith.constant 0 : index
    %30 = vector.load %arg2[%29, %c0_14, %c0_15] : memref<8x16x128xf32, #tpu.memory_space<vmem>>, vector<1x16x128xf32>
    %31 = vector.shape_cast %30 : vector<1x16x128xf32> to vector<16x128xf32>
    %32 = vector.shape_cast %28 : vector<16x128xf32> to vector<1x16x128xf32>
    tpu.vector_store %arg2[%29, %c0_14, %c0_15], %32 {strides = array<i32>} : memref<8x16x128xf32, #tpu.memory_space<vmem>>, vector<1x16x128xf32>,
    %cst_16 = arith.constant 0.000000e+00 : f32
    %33 = vector.broadcast %cst_16 : f32 to vector<16x128xf32>
    %34 = arith.select %25, %33, %23 : vector<16x128xi1>, vector<16x128xf32>
    %c2_i32 = arith.constant 2 : i32
    %cst_17 = arith.constant 1.000000e+00 : f32
    %35 = vector.broadcast %cst_17 : f32 to vector<16x128xf32>
    %36 = arith.mulf %34, %35 : vector<16x128xf32>
    %37 = arith.index_cast %c2_i32 : i32 to index
    %c0_18 = arith.constant 0 : index
    %c0_19 = arith.constant 0 : index
    %38 = vector.load %arg1[%37, %c0_18, %c0_19] : memref<8x16x128xf32, #tpu.memory_space<vmem>>, vector<1x16x128xf32>
    %39 = vector.shape_cast %38 : vector<1x16x128xf32> to vector<16x128xf32>
    %40 = arith.addf %36, %39 : vector<16x128xf32>
    %cst_20 = arith.constant 1.000000e+00 : f32
    %41 = vector.broadcast %cst_20 : f32 to vector<16x128xf32>
    %42 = arith.cmpf oge, %40, %41 : vector<16x128xf32>
    %cst_21 = arith.constant 1.000000e+00 : f32
    %cst_22 = arith.constant 0.000000e+00 : f32
    %43 = vector.broadcast %cst_21 : f32 to vector<16x128xf32>
    %44 = vector.broadcast %cst_22 : f32 to vector<16x128xf32>
    %45 = arith.select %42, %43, %44 : vector<16x128xi1>, vector<16x128xf32>
    %46 = arith.index_cast %c2_i32 : i32 to index
    %c0_23 = arith.constant 0 : index
    %c0_24 = arith.constant 0 : index
    %47 = vector.load %arg2[%46, %c0_23, %c0_24] : memref<8x16x128xf32, #tpu.memory_space<vmem>>, vector<1x16x128xf32>
    %48 = vector.shape_cast %47 : vector<1x16x128xf32> to vector<16x128xf32>
    %49 = vector.shape_cast %45 : vector<16x128xf32> to vector<1x16x128xf32>
    tpu.vector_store %arg2[%46, %c0_23, %c0_24], %49 {strides = array<i32>} : memref<8x16x128xf32, #tpu.memory_space<vmem>>, vector<1x16x128xf32>,
    %cst_25 = arith.constant 0.000000e+00 : f32
    %50 = vector.broadcast %cst_25 : f32 to vector<16x128xf32>
    %51 = arith.select %42, %50, %40 : vector<16x128xi1>, vector<16x128xf32>
    %c3_i32 = arith.constant 3 : i32
    %cst_26 = arith.constant 1.000000e+00 : f32
    %52 = vector.broadcast %cst_26 : f32 to vector<16x128xf32>
    %53 = arith.mulf %51, %52 : vector<16x128xf32>
    %54 = arith.index_cast %c3_i32 : i32 to index
    %c0_27 = arith.constant 0 : index
    %c0_28 = arith.constant 0 : index
    %55 = vector.load %arg1[%54, %c0_27, %c0_28] : memref<8x16x128xf32, #tpu.memory_space<vmem>>, vector<1x16x128xf32>
    %56 = vector.shape_cast %55 : vector<1x16x128xf32> to vector<16x128xf32>
    %57 = arith.addf %53, %56 : vector<16x128xf32>
    %cst_29 = arith.constant 1.000000e+00 : f32
    %58 = vector.broadcast %cst_29 : f32 to vector<16x128xf32>
    %59 = arith.cmpf oge, %57, %58 : vector<16x128xf32>
    %cst_30 = arith.constant 1.000000e+00 : f32
    %cst_31 = arith.constant 0.000000e+00 : f32
    %60 = vector.broadcast %cst_30 : f32 to vector<16x128xf32>
    %61 = vector.broadcast %cst_31 : f32 to vector<16x128xf32>
    %62 = arith.select %59, %60, %61 : vector<16x128xi1>, vector<16x128xf32>
    %63 = arith.index_cast %c3_i32 : i32 to index
    %c0_32 = arith.constant 0 : index
    %c0_33 = arith.constant 0 : index
    %64 = vector.load %arg2[%63, %c0_32, %c0_33] : memref<8x16x128xf32, #tpu.memory_space<vmem>>, vector<1x16x128xf32>
    %65 = vector.shape_cast %64 : vector<1x16x128xf32> to vector<16x128xf32>
    %66 = vector.shape_cast %62 : vector<16x128xf32> to vector<1x16x128xf32>
    tpu.vector_store %arg2[%63, %c0_32, %c0_33], %66 {strides = array<i32>} : memref<8x16x128xf32, #tpu.memory_space<vmem>>, vector<1x16x128xf32>,
    %cst_34 = arith.constant 0.000000e+00 : f32
    %67 = vector.broadcast %cst_34 : f32 to vector<16x128xf32>
    %68 = arith.select %59, %67, %57 : vector<16x128xi1>, vector<16x128xf32>
    %c4_i32 = arith.constant 4 : i32
    %cst_35 = arith.constant 1.000000e+00 : f32
    %69 = vector.broadcast %cst_35 : f32 to vector<16x128xf32>
    %70 = arith.mulf %68, %69 : vector<16x128xf32>
    %71 = arith.index_cast %c4_i32 : i32 to index
    %c0_36 = arith.constant 0 : index
    %c0_37 = arith.constant 0 : index
    %72 = vector.load %arg1[%71, %c0_36, %c0_37] : memref<8x16x128xf32, #tpu.memory_space<vmem>>, vector<1x16x128xf32>
    %73 = vector.shape_cast %72 : vector<1x16x128xf32> to vector<16x128xf32>
    %74 = arith.addf %70, %73 : vector<16x128xf32>
    %cst_38 = arith.constant 1.000000e+00 : f32
    %75 = vector.broadcast %cst_38 : f32 to vector<16x128xf32>
    %76 = arith.cmpf oge, %74, %75 : vector<16x128xf32>
    %cst_39 = arith.constant 1.000000e+00 : f32
    %cst_40 = arith.constant 0.000000e+00 : f32
    %77 = vector.broadcast %cst_39 : f32 to vector<16x128xf32>
    %78 = vector.broadcast %cst_40 : f32 to vector<16x128xf32>
    %79 = arith.select %76, %77, %78 : vector<16x128xi1>, vector<16x128xf32>
    %80 = arith.index_cast %c4_i32 : i32 to index
    %c0_41 = arith.constant 0 : index
    %c0_42 = arith.constant 0 : index
    %81 = vector.load %arg2[%80, %c0_41, %c0_42] : memref<8x16x128xf32, #tpu.memory_space<vmem>>, vector<1x16x128xf32>
    %82 = vector.shape_cast %81 : vector<1x16x128xf32> to vector<16x128xf32>
    %83 = vector.shape_cast %79 : vector<16x128xf32> to vector<1x16x128xf32>
    tpu.vector_store %arg2[%80, %c0_41, %c0_42], %83 {strides = array<i32>} : memref<8x16x128xf32, #tpu.memory_space<vmem>>, vector<1x16x128xf32>,
    %cst_43 = arith.constant 0.000000e+00 : f32
    %84 = vector.broadcast %cst_43 : f32 to vector<16x128xf32>
    %85 = arith.select %76, %84, %74 : vector<16x128xi1>, vector<16x128xf32>
    %c5_i32 = arith.constant 5 : i32
    %cst_44 = arith.constant 1.000000e+00 : f32
    %86 = vector.broadcast %cst_44 : f32 to vector<16x128xf32>
    %87 = arith.mulf %85, %86 : vector<16x128xf32>
    %88 = arith.index_cast %c5_i32 : i32 to index
    %c0_45 = arith.constant 0 : index
    %c0_46 = arith.constant 0 : index
    %89 = vector.load %arg1[%88, %c0_45, %c0_46] : memref<8x16x128xf32, #tpu.memory_space<vmem>>, vector<1x16x128xf32>
    %90 = vector.shape_cast %89 : vector<1x16x128xf32> to vector<16x128xf32>
    %91 = arith.addf %87, %90 : vector<16x128xf32>
    %cst_47 = arith.constant 1.000000e+00 : f32
    %92 = vector.broadcast %cst_47 : f32 to vector<16x128xf32>
    %93 = arith.cmpf oge, %91, %92 : vector<16x128xf32>
    %cst_48 = arith.constant 1.000000e+00 : f32
    %cst_49 = arith.constant 0.000000e+00 : f32
    %94 = vector.broadcast %cst_48 : f32 to vector<16x128xf32>
    %95 = vector.broadcast %cst_49 : f32 to vector<16x128xf32>
    %96 = arith.select %93, %94, %95 : vector<16x128xi1>, vector<16x128xf32>
    %97 = arith.index_cast %c5_i32 : i32 to index
    %c0_50 = arith.constant 0 : index
    %c0_51 = arith.constant 0 : index
    %98 = vector.load %arg2[%97, %c0_50, %c0_51] : memref<8x16x128xf32, #tpu.memory_space<vmem>>, vector<1x16x128xf32>
    %99 = vector.shape_cast %98 : vector<1x16x128xf32> to vector<16x128xf32>
    %100 = vector.shape_cast %96 : vector<16x128xf32> to vector<1x16x128xf32>
    tpu.vector_store %arg2[%97, %c0_50, %c0_51], %100 {strides = array<i32>} : memref<8x16x128xf32, #tpu.memory_space<vmem>>, vector<1x16x128xf32>,
    %cst_52 = arith.constant 0.000000e+00 : f32
    %101 = vector.broadcast %cst_52 : f32 to vector<16x128xf32>
    %102 = arith.select %93, %101, %91 : vector<16x128xi1>, vector<16x128xf32>
    %c6_i32 = arith.constant 6 : i32
    %cst_53 = arith.constant 1.000000e+00 : f32
    %103 = vector.broadcast %cst_53 : f32 to vector<16x128xf32>
    %104 = arith.mulf %102, %103 : vector<16x128xf32>
    %105 = arith.index_cast %c6_i32 : i32 to index
    %c0_54 = arith.constant 0 : index
    %c0_55 = arith.constant 0 : index
    %106 = vector.load %arg1[%105, %c0_54, %c0_55] : memref<8x16x128xf32, #tpu.memory_space<vmem>>, vector<1x16x128xf32>
    %107 = vector.shape_cast %106 : vector<1x16x128xf32> to vector<16x128xf32>
    %108 = arith.addf %104, %107 : vector<16x128xf32>
    %cst_56 = arith.constant 1.000000e+00 : f32
    %109 = vector.broadcast %cst_56 : f32 to vector<16x128xf32>
    %110 = arith.cmpf oge, %108, %109 : vector<16x128xf32>
    %cst_57 = arith.constant 1.000000e+00 : f32
    %cst_58 = arith.constant 0.000000e+00 : f32
    %111 = vector.broadcast %cst_57 : f32 to vector<16x128xf32>
    %112 = vector.broadcast %cst_58 : f32 to vector<16x128xf32>
    %113 = arith.select %110, %111, %112 : vector<16x128xi1>, vector<16x128xf32>
    %114 = arith.index_cast %c6_i32 : i32 to index
    %c0_59 = arith.constant 0 : index
    %c0_60 = arith.constant 0 : index
    %115 = vector.load %arg2[%114, %c0_59, %c0_60] : memref<8x16x128xf32, #tpu.memory_space<vmem>>, vector<1x16x128xf32>
    %116 = vector.shape_cast %115 : vector<1x16x128xf32> to vector<16x128xf32>
    %117 = vector.shape_cast %113 : vector<16x128xf32> to vector<1x16x128xf32>
    tpu.vector_store %arg2[%114, %c0_59, %c0_60], %117 {strides = array<i32>} : memref<8x16x128xf32, #tpu.memory_space<vmem>>, vector<1x16x128xf32>,
    %cst_61 = arith.constant 0.000000e+00 : f32
    %118 = vector.broadcast %cst_61 : f32 to vector<16x128xf32>
    %119 = arith.select %110, %118, %108 : vector<16x128xi1>, vector<16x128xf32>
    %c7_i32 = arith.constant 7 : i32
    %cst_62 = arith.constant 1.000000e+00 : f32
    %120 = vector.broadcast %cst_62 : f32 to vector<16x128xf32>
    %121 = arith.mulf %119, %120 : vector<16x128xf32>
    %122 = arith.index_cast %c7_i32 : i32 to index
    %c0_63 = arith.constant 0 : index
    %c0_64 = arith.constant 0 : index
    %123 = vector.load %arg1[%122, %c0_63, %c0_64] : memref<8x16x128xf32, #tpu.memory_space<vmem>>, vector<1x16x128xf32>
    %124 = vector.shape_cast %123 : vector<1x16x128xf32> to vector<16x128xf32>
    %125 = arith.addf %121, %124 : vector<16x128xf32>
    %cst_65 = arith.constant 1.000000e+00 : f32
    %126 = vector.broadcast %cst_65 : f32 to vector<16x128xf32>
    %127 = arith.cmpf oge, %125, %126 : vector<16x128xf32>
    %cst_66 = arith.constant 1.000000e+00 : f32
    %cst_67 = arith.constant 0.000000e+00 : f32
    %128 = vector.broadcast %cst_66 : f32 to vector<16x128xf32>
    %129 = vector.broadcast %cst_67 : f32 to vector<16x128xf32>
    %130 = arith.select %127, %128, %129 : vector<16x128xi1>, vector<16x128xf32>
    %131 = arith.index_cast %c7_i32 : i32 to index
    %c0_68 = arith.constant 0 : index
    %c0_69 = arith.constant 0 : index
    %132 = vector.load %arg2[%131, %c0_68, %c0_69] : memref<8x16x128xf32, #tpu.memory_space<vmem>>, vector<1x16x128xf32>
    %133 = vector.shape_cast %132 : vector<1x16x128xf32> to vector<16x128xf32>
    %134 = vector.shape_cast %130 : vector<16x128xf32> to vector<1x16x128xf32>
    tpu.vector_store %arg2[%131, %c0_68, %c0_69], %134 {strides = array<i32>} : memref<8x16x128xf32, #tpu.memory_space<vmem>>, vector<1x16x128xf32>,
    %cst_70 = arith.constant 0.000000e+00 : f32
    %135 = vector.broadcast %cst_70 : f32 to vector<16x128xf32>
    %136 = arith.select %127, %135, %125 : vector<16x128xi1>, vector<16x128xf32>
    %c8_i32 = arith.constant 8 : i32
    return
  }
  func.func @transform_0(%arg0: i32) -> (i32, i32, i32) {
    %c0_i32 = arith.constant 0 : i32
    %c0_i32_0 = arith.constant 0 : i32
    %c0_i32_1 = arith.constant 0 : i32
    return %c0_i32, %arg0, %c0_i32_0 : i32, i32, i32
  }
  func.func @transform_1(%arg0: i32) -> (i32, i32, i32) {
    %c0_i32 = arith.constant 0 : i32
    %c0_i32_0 = arith.constant 0 : i32
    %c0_i32_1 = arith.constant 0 : i32
    return %c0_i32, %arg0, %c0_i32_0 : i32, i32, i32
  }
}

</mosaic_0001>

<bundles_post_ra>
// kernel: tpu_custom_call.1
= control target key start
LH: loop header
LB: loop body
LE: loop exit
PB: predicated region body
PF: predicated region fallthrough
CT: control target
= control target key end

     0   :  { %6 = vsyncpa [#allocation3], 0  ;;  %s262_s0 = inlined_call_operand.hbm [shape: f32[8,16,128], index: 0, kind: input, shape index: {}]   ;;  %s263_s1 = inlined_call_operand.hbm [shape: f32[8,16,128], index: 1, kind: output, shape index: {}]  }
   0x1   :  { %7 = vsyncpa [#allocation4], 0  ;;  %s201_s6 = smov [#allocation2]   ;;  %s153_s10 = scalar_lea.hbm %s262_s0, 2048 }
   0x2   :  { %s13_s7 = sshll.u32 %s201_s6, 4  ;;  %p154_p0 = scmp.ne.s32.totalorder %s262_s0, %s153_s10  ;;  %s14_s7 = int_to_ptr.vmem [resolvable:$true] %s13_s7 }
   0x3   :  { %p157_p1 = scmp.lt.u32.totalorder %s153_s10, %s262_s0 }
   0x5   :  { %p159_p2 = pnand %p157_p1, %p154_p0 }
   0x7   :  { %162 = shalt.err (!%p159_p2)
}
   0x8   :  { %s163_s15 = scalar_lea.vmem %s14_s7, 2048  ;;  %p168_p4 = scmp.lt.s32.totalorder %s14_s7, %s14_s7 }
   0x9   :  { %p164_p3 = scmp.ne.s32.totalorder %s14_s7, %s163_s15  ;;  %p169_p5 = scmp.lt.s32.totalorder %s163_s15, %s163_s15 }
   0xb   :  { %p170_p6 = por %p169_p5, %p168_p4 }
   0xd   :  { %p171_p7 = pnand %p170_p6, %p164_p3 }
   0xf   :  { %174 = shalt.err (!%p171_p7)
}
  0x10   :  { %s202_s16 = smov 128   ;;  %s203_s17 = smov 8  }
  0x11   :  { %19 = dma.hbm_to_vmem [thread:$0]  %s262_s0, 2048, %s14_s7, [#allocation3], %s202_s16, %s202_s16, %s203_s17  }
  0x12   :  { %197 = dma.done.wait [#allocation3], 2048  }
  0x13   :  { %198 = vsyncadd [#allocation3], 4294965248  ;;  %v23_v0 = vld [vmem:[#allocation2] sm:$0xff]  ;;  %v24_v1 = vld [vmem:[#allocation2 + $0x8] sm:$0xff]  ;;  %v204_v4 = vmov 0.0   ;;  %s205_s0 = smov [#allocation5]  }
  0x14   :  { %v36_v2 = vld [vmem:[#allocation2 + $0x10] sm:$0xff]  ;;  %vm27_vm0 = vcmp.ge.f32.partialorder %v23_v0, 1.0  ;;  %vm28_vm1 = vcmp.ge.f32.partialorder %v24_v1, 1.0  ;;  %v37_v3 = vld [vmem:[#allocation2 + $0x18] sm:$0xff]  ;;  %v50_v11 = vld [vmem:[#allocation2 + $0x20] sm:$0xff]  ;;  %s136_s20 = sshll.u32 %s205_s0, 4  ;;  %s137_s20 = int_to_ptr.vmem [resolvable:$true] %s136_s20 }
  0x15   :  { %v29_v5 = vsel %vm27_vm0, 1.0, %v204_v4  ;;  %v33_v6 = vsel %vm27_vm0, 0.0, %v23_v0  ;;  %v30_v7 = vsel %vm28_vm1, 1.0, %v204_v4  ;;  %v34_v8 = vsel %vm28_vm1, 0.0, %v24_v1  ;;  %v51_v12 = vld [vmem:[#allocation2 + $0x28] sm:$0xff]  ;;  %v64_v19 = vld [vmem:[#allocation2 + $0x30] sm:$0xff]  ;;  %p180_p9 = scmp.lt.s32.totalorder %s137_s20, %s137_s20 }
  0x16   :  { %31 = vst [vmem:[#allocation5] sm:$0xff] %v29_v5  ;;  %32 = vst [vmem:[#allocation5 + $0x8] sm:$0xff] %v30_v7  ;;  %v38_v9 = vadd.f32 %v36_v2, %v33_v6  ;;  %v39_v10 = vadd.f32 %v37_v3, %v34_v8  ;;  %v65_v20 = vld [vmem:[#allocation2 + $0x38] sm:$0xff]  ;;  %v78_v27 = vld [vmem:[#allocation2 + $0x40] sm:$0xff]  ;;  %s175_s21 = scalar_lea.vmem %s137_s20, 2048 }
  0x17   :  { %v79_v28 = vld [vmem:[#allocation2 + $0x48] sm:$0xff]  ;;  %v92_v35 = vld [vmem:[#allocation2 + $0x50] sm:$0xff]  ;;  %v93_v36 = vld [vmem:[#allocation2 + $0x58] sm:$0xff]  ;;  %p176_p8 = scmp.ne.s32.totalorder %s137_s20, %s175_s21  ;;  %p181_p10 = scmp.lt.s32.totalorder %s175_s21, %s175_s21 }
  0x18   :  { %vm40_vm2 = vcmp.ge.f32.partialorder %v38_v9, 1.0  ;;  %vm41_vm3 = vcmp.ge.f32.partialorder %v39_v10, 1.0  ;;  %v106_v43 = vld [vmem:[#allocation2 + $0x60] sm:$0xff]  ;;  %v107_v44 = vld [vmem:[#allocation2 + $0x68] sm:$0xff]  ;;  %v120_v51 = vld [vmem:[#allocation2 + $0x70] sm:$0xff] }
  0x19   :  { %v42_v13 = vsel %vm40_vm2, 1.0, %v204_v4  ;;  %v47_v14 = vsel %vm40_vm2, 0.0, %v38_v9  ;;  %v43_v15 = vsel %vm41_vm3, 1.0, %v204_v4  ;;  %v48_v16 = vsel %vm41_vm3, 0.0, %v39_v10  ;;  %v121_v52 = vld [vmem:[#allocation2 + $0x78] sm:$0xff]  ;;  %p182_p11 = por %p181_p10, %p180_p9 }
  0x1a   :  { %45 = vst [vmem:[#allocation5 + $0x10] sm:$0xff] %v42_v13  ;;  %46 = vst [vmem:[#allocation5 + $0x18] sm:$0xff] %v43_v15  ;;  %v52_v17 = vadd.f32 %v50_v11, %v47_v14  ;;  %v53_v18 = vadd.f32 %v51_v12, %v48_v16 }
  0x1b   :  { %p183_p12 = pnand %p182_p11, %p176_p8 }
  0x1c   :  { %vm54_vm4 = vcmp.ge.f32.partialorder %v52_v17, 1.0  ;;  %vm55_vm5 = vcmp.ge.f32.partialorder %v53_v18, 1.0 }
  0x1d   :  { %v56_v21 = vsel %vm54_vm4, 1.0, %v204_v4  ;;  %v61_v22 = vsel %vm54_vm4, 0.0, %v52_v17  ;;  %v57_v23 = vsel %vm55_vm5, 1.0, %v204_v4  ;;  %v62_v24 = vsel %vm55_vm5, 0.0, %v53_v18 }
  0x1e   :  { %59 = vst [vmem:[#allocation5 + $0x20] sm:$0xff] %v56_v21  ;;  %60 = vst [vmem:[#allocation5 + $0x28] sm:$0xff] %v57_v23  ;;  %v66_v25 = vadd.f32 %v64_v19, %v61_v22  ;;  %v67_v26 = vadd.f32 %v65_v20, %v62_v24 }
  0x20   :  { %vm68_vm6 = vcmp.ge.f32.partialorder %v66_v25, 1.0  ;;  %vm69_vm7 = vcmp.ge.f32.partialorder %v67_v26, 1.0 }
  0x21   :  { %v70_v29 = vsel %vm68_vm6, 1.0, %v204_v4  ;;  %v75_v30 = vsel %vm68_vm6, 0.0, %v66_v25  ;;  %v71_v31 = vsel %vm69_vm7, 1.0, %v204_v4  ;;  %v76_v32 = vsel %vm69_vm7, 0.0, %v67_v26 }
  0x22   :  { %73 = vst [vmem:[#allocation5 + $0x30] sm:$0xff] %v70_v29  ;;  %74 = vst [vmem:[#allocation5 + $0x38] sm:$0xff] %v71_v31  ;;  %v80_v33 = vadd.f32 %v78_v27, %v75_v30  ;;  %v81_v34 = vadd.f32 %v79_v28, %v76_v32 }
  0x24   :  { %vm82_vm8 = vcmp.ge.f32.partialorder %v80_v33, 1.0  ;;  %vm83_vm9 = vcmp.ge.f32.partialorder %v81_v34, 1.0 }
  0x25   :  { %v84_v37 = vsel %vm82_vm8, 1.0, %v204_v4  ;;  %v89_v38 = vsel %vm82_vm8, 0.0, %v80_v33  ;;  %v85_v39 = vsel %vm83_vm9, 1.0, %v204_v4  ;;  %v90_v40 = vsel %vm83_vm9, 0.0, %v81_v34 }
  0x26   :  { %87 = vst [vmem:[#allocation5 + $0x40] sm:$0xff] %v84_v37  ;;  %88 = vst [vmem:[#allocation5 + $0x48] sm:$0xff] %v85_v39  ;;  %v94_v41 = vadd.f32 %v92_v35, %v89_v38  ;;  %v95_v42 = vadd.f32 %v93_v36, %v90_v40 }
  0x28   :  { %vm96_vm10 = vcmp.ge.f32.partialorder %v94_v41, 1.0  ;;  %vm97_vm11 = vcmp.ge.f32.partialorder %v95_v42, 1.0 }
  0x29   :  { %v98_v45 = vsel %vm96_vm10, 1.0, %v204_v4  ;;  %v103_v46 = vsel %vm96_vm10, 0.0, %v94_v41  ;;  %v99_v47 = vsel %vm97_vm11, 1.0, %v204_v4  ;;  %v104_v48 = vsel %vm97_vm11, 0.0, %v95_v42 }
  0x2a   :  { %101 = vst [vmem:[#allocation5 + $0x50] sm:$0xff] %v98_v45  ;;  %102 = vst [vmem:[#allocation5 + $0x58] sm:$0xff] %v99_v47  ;;  %v108_v49 = vadd.f32 %v106_v43, %v103_v46  ;;  %v109_v50 = vadd.f32 %v107_v44, %v104_v48 }
  0x2c   :  { %vm110_vm12 = vcmp.ge.f32.partialorder %v108_v49, 1.0  ;;  %vm111_vm13 = vcmp.ge.f32.partialorder %v109_v50, 1.0 }
  0x2d   :  { %v112_v53 = vsel %vm110_vm12, 1.0, %v204_v4  ;;  %v117_v54 = vsel %vm110_vm12, 0.0, %v108_v49  ;;  %v113_v55 = vsel %vm111_vm13, 1.0, %v204_v4  ;;  %v118_v56 = vsel %vm111_vm13, 0.0, %v109_v50 }
  0x2e   :  { %115 = vst [vmem:[#allocation5 + $0x60] sm:$0xff] %v112_v53  ;;  %116 = vst [vmem:[#allocation5 + $0x68] sm:$0xff] %v113_v55  ;;  %v122_v57 = vadd.f32 %v120_v51, %v117_v54  ;;  %v123_v58 = vadd.f32 %v121_v52, %v118_v56 }
  0x30   :  { %vm124_vm14 = vcmp.ge.f32.partialorder %v122_v57, 1.0  ;;  %vm125_vm15 = vcmp.ge.f32.partialorder %v123_v58, 1.0 }
  0x31   :  { %v126_v59 = vsel %vm124_vm14, 1.0, %v204_v4  ;;  %v127_v60 = vsel %vm125_vm15, 1.0, %v204_v4 }
  0x32   :  { %129 = vst [vmem:[#allocation5 + $0x70] sm:$0xff] %v126_v59  ;;  %130 = vst [vmem:[#allocation5 + $0x78] sm:$0xff] %v127_v60 }
  0x33   :  { %186 = shalt.err (!%p183_p12)
}
  0x34   :  { %s187_s24 = scalar_lea.hbm %s263_s1, 2048 }
  0x35   :  { %p188_p13 = scmp.ne.s32.totalorder %s263_s1, %s187_s24  ;;  %p191_p0 = scmp.lt.u32.totalorder %s187_s24, %s263_s1 }
  0x37   :  { %p193_p1 = pnand %p191_p0, %p188_p13 }
  0x39   :  { %196 = shalt.err (!%p193_p1)
}
  0x3a   :  { %142 = dma.vmem_to_hbm [thread:$0]  %s137_s20, 2048, %s263_s1, [#allocation4], %s202_s16, %s202_s16, %s203_s17  }
  0x3b   :  { %199 = dma.done.wait [#allocation4], 2048  }
  0x3c   :  { %200 = vsyncadd [#allocation4], 4294965248 }
  0x3d   :  { %146 = vsyncpa [#allocation3], 1 }
  0x3e   :  { %147 = vsyncpa [#allocation4], 1 }

</bundles_post_ra>
